<compile_context>
chip_gen: v5e
topology: v5e:2x2
jax: 0.10.0
libtpu: 0.0.40
codegen_flags: <defaults>
</compile_context>

<pallas_src>
import functools

import jax
import jax.numpy as jnp
from jax.experimental import pallas as pl
from jax.experimental.pallas import tpu as pltpu


def _round_up(x, m):
    return (x + m - 1) // m * m


def input_phase_kernel(tok_smem, cnt_smem, aux_ref, w_ref, table_ref, out_ref,
                       *, eps, n_types):
    """One row-tile of the flattened [B*S, D] problem per grid step.

    tok_smem  : (N_pad,)      int32 SMEM (scalar prefetch) token ids
    cnt_smem  : (n_tiles,)    int32 SMEM (scalar prefetch) per-tile marker count
    aux_ref   : (TM, AUX_W)   f32   [value * type one-hot | marker mask | 0...]
    w_ref     : (AUX_W, D)    f32   zero-padded metadata type projection table
    table_ref : (V, D)              embedding table, resident in VMEM
    out_ref   : (TM, D)             output embeddings (storage dtype)
    """
    tm = out_ref.shape[0]
    base = pl.program_id(0) * tm

    # --- 1) embedding lookup: dynamic-row reads from the VMEM-resident table,
    #        written straight to the output tile (no HBM DMAs, no f32 temp). --
    @pl.loop(0, tm)
    def _gather(r):
        tok = tok_smem[base + r]
        out_ref[pl.ds(r, 1), :] = table_ref[pl.ds(tok, 1), :]

    # --- 2+3) metadata representation, only for tiles that contain markers. --
    @pl.when(cnt_smem[pl.program_id(0)] > 0)
    def _meta():
        aux = aux_ref[...]                                      # (TM, AUX_W) f32
        # (value * type one-hot) @ W_type on the otherwise-idle MXU; the
        # padded rows of w_ref are zero so only the NT real columns contribute.
        rep = jnp.dot(aux, w_ref[...],
                      preferred_element_type=jnp.float32,
                      precision=jax.lax.Precision.HIGHEST)      # (TM, D)
        ms = jnp.mean(rep * rep, axis=-1, keepdims=True)        # XLU lane reduce
        rep = rep * jax.lax.rsqrt(ms + eps)                     # RMSNorm(eps), f32
        is_meta = aux[:, n_types:n_types + 1] > 0.5             # (TM, 1)
        # Final select in the storage dtype: marker rows take the metadata rep.
        out_ref[...] = jnp.where(is_meta, rep.astype(out_ref.dtype), out_ref[...])


def input_phase_forward(tokens, meta_vals, type_idx, meta_mask,
                        emb_table, w_type, *, eps=1e-5, row_tile=256):
    """tokens, meta_vals, type_idx, meta_mask: [B, S]; emb_table: [V, D];
    w_type: [NT, D].  Returns [B, S, D] in emb_table.dtype."""
    B, S = tokens.shape
    V, D = emb_table.shape
    NT = w_type.shape[0]
    N = B * S

    table_bytes = V * D * jnp.dtype(emb_table.dtype).itemsize
    if table_bytes > (16 << 20):
        # TODO(synk): fall back to an HBM-resident table with double-buffered,
        # bulk-waited row-gather DMAs for vocabularies that don't fit VMEM.
        raise NotImplementedError("embedding table too large for VMEM-resident path")

    # Row tiling over the flattened (B*S, D) problem.  Keep at least 2 tiles
    # (when N allows it) so the ("parallel",) axis shards across both v7x TCs.
    tm = min(_round_up(row_tile, 8), _round_up(N, 8))
    if N > 8 and _round_up(N, tm) // tm < 2:
        tm = _round_up((N + 1) // 2, 8)
    n_pad = _round_up(N, tm)
    n_tiles = n_pad // tm

    # Token ids -> SMEM scalar prefetch (clamped like the JAX gather reference).
    tok = jnp.clip(tokens.reshape(N).astype(jnp.int32), 0, V - 1)
    tok = jnp.pad(tok, (0, n_pad - N))

    # Lane-dense side-band (full 128-lane width, no masked partial loads):
    # columns [0, NT)  = value * type one-hot   (value folded host-side)
    # column  NT       = marker mask (1.0 / 0.0)
    aux_w = max(128, _round_up(NT + 1, 128))
    mask_f = (meta_mask.reshape(N) > 0).astype(jnp.float32)
    onehot = (type_idx.reshape(N, 1).astype(jnp.int32)
              == jnp.arange(NT, dtype=jnp.int32)[None, :]).astype(jnp.float32)
    aux = jnp.zeros((n_pad, aux_w), jnp.float32)
    aux = aux.at[:N, :NT].set(onehot * meta_vals.reshape(N, 1).astype(jnp.float32))
    aux = aux.at[:N, NT].set(mask_f)

    # Zero-padded projection table so the full-width aux feeds one MXU matmul.
    w_pad = jnp.zeros((aux_w, D), jnp.float32).at[:NT].set(w_type.astype(jnp.float32))

    # Per-tile marker counts -> skip the metadata branch for marker-free tiles.
    cnt = jnp.pad(mask_f, (0, n_pad - N)).reshape(n_tiles, tm).sum(axis=1)
    cnt = cnt.astype(jnp.int32)

    out_dtype = emb_table.dtype
    itemsize = jnp.dtype(out_dtype).itemsize
    vmem_bytes = (table_bytes + aux_w * D * 4            # resident table + W
                  + 2 * tm * aux_w * 4                   # double-buffered aux
                  + 2 * tm * D * itemsize                # double-buffered out tile
                  + tm * D * 4                           # f32 rep temporaries
                  + (2 << 20))                           # slack
    vmem_limit = int(min(max(vmem_bytes, 8 << 20), 48 << 20))  # <=48 MiB: v7x headroom

    kernel = functools.partial(input_phase_kernel, eps=eps, n_types=NT)

    grid_spec = pltpu.PrefetchScalarGridSpec(
        num_scalar_prefetch=2,
        grid=(n_tiles,),
        in_specs=[
            pl.BlockSpec((tm, aux_w), lambda i, tok, cnt: (i, 0)),   # side-band
            pl.BlockSpec((aux_w, D), lambda i, tok, cnt: (0, 0)),    # W_type (padded)
            pl.BlockSpec((V, D), lambda i, tok, cnt: (0, 0)),        # table: VMEM-resident
        ],
        out_specs=pl.BlockSpec((tm, D), lambda i, tok, cnt: (i, 0)),
    )

    out = pl.pallas_call(
        kernel,
        out_shape=jax.ShapeDtypeStruct((n_pad, D), out_dtype),
        grid_spec=grid_spec,
        compiler_params=pltpu.CompilerParams(
            dimension_semantics=("parallel",),
            vmem_limit_bytes=vmem_limit),
    )(tok, cnt, aux, w_pad, emb_table)

    return out[:N].reshape(B, S, D)


if __name__ == "__main__":
    # Small shapes implied by ModelArgs: seq_len=8, dim=128, vocab_size=64.
    B, S, D, V = 2, 8, 128, 64
    EPS = 1e-5

    key = jax.random.PRNGKey(0)
    k_tab, k_typ, k_tok, k_val = jax.random.split(key, 4)

    # Deterministic "parameters".
    emb_table = jax.random.normal(k_tab, (V, D), dtype=jnp.float32) * 0.02
    # One projection vector per metadata type: 0=number, 1=amount, 2=date.
    W_type = jax.random.normal(k_typ, (3, D), dtype=jnp.float32)

    # Deterministic example inputs.
    tokens = jax.random.randint(k_tok, (B, S), 0, V, dtype=jnp.int32)
    meta_vals = jax.random.normal(k_val, (B, S), dtype=jnp.float32)

    # Token ids {0, 1, 2} play the role of meta markers (number/amount/date);
    # force a few so both the embedding and metadata paths are exercised.
    tokens = tokens.at[0, 1].set(0)
    tokens = tokens.at[0, 5].set(1)
    tokens = tokens.at[1, 3].set(2)
    meta_mask = (tokens < 3).astype(jnp.int32)
    type_idx = jnp.clip(tokens, 0, 2)

    out = input_phase_forward(tokens, meta_vals, type_idx, meta_mask,
                              emb_table, W_type, eps=EPS)
    out = jax.block_until_ready(out)

    # Pure-JAX reference check.
    gathered_ref = emb_table[tokens]                                  # (B,S,D)
    rep_ref = meta_vals[..., None] * W_type[type_idx]
    rep_ref = rep_ref * jax.lax.rsqrt(
        jnp.mean(rep_ref * rep_ref, axis=-1, keepdims=True) + EPS)
    ref = jnp.where(meta_mask[..., None] > 0, rep_ref, gathered_ref)

    if not jnp.allclose(out, ref, atol=1e-5, rtol=1e-5):
        raise AssertionError("Pallas kernel output mismatch vs JAX reference")

    print("KERNEL_OK")
</pallas_src>

<mosaic_0001>
module attributes {stable_mosaic.version = 11 : i64} {
  func.func @input_phase_kernel(%arg0: i32, %arg1: memref<16xi32, #tpu.memory_space<smem>>, %arg2: memref<2xi32, #tpu.memory_space<smem>>, %arg3: memref<8x128xf32, #tpu.memory_space<vmem>>, %arg4: memref<128x128xf32, #tpu.memory_space<vmem>>, %arg5: memref<64x128xf32, #tpu.memory_space<vmem>>, %arg6: memref<8x128xf32, #tpu.memory_space<vmem>>) attributes {dimension_semantics = [#tpu.dimension_semantics<parallel>], iteration_bounds = array<i64: 2>, scalar_prefetch = 2 : i64, scratch_operands = 0 : i64, tpu.core_type = #tpu.core_type<tc>, window_params = [{transform_indices = @transform_0, window_bounds = array<i64: 8, 128>}, {pipeline_mode = #tpu.pipeline_mode<synchronous>, transform_indices = @transform_1, window_bounds = array<i64: 128, 128>}, {pipeline_mode = #tpu.pipeline_mode<synchronous>, transform_indices = @transform_2, window_bounds = array<i64: 64, 128>}, {transform_indices = @transform_3, window_bounds = array<i64: 8, 128>}]} {
    %c8_i32 = arith.constant 8 : i32
    %0 = arith.muli %arg0, %c8_i32 : i32
    %c0_i32 = arith.constant 0 : i32
    %c8_i32_0 = arith.constant 8 : i32
    %1 = arith.addi %c0_i32, %c8_i32_0 : i32
    %c1_i32 = arith.constant 1 : i32
    scf.for %arg7 = %c0_i32 to %1 step %c1_i32  : i32 {
      %c1_i32_4 = arith.constant 1 : i32
      %7 = arith.muli %arg7, %c1_i32_4 : i32
      %c0_i32_5 = arith.constant 0 : i32
      %8 = arith.addi %c0_i32_5, %7 : i32
      %9 = arith.addi %0, %8 : i32
      %10 = arith.index_cast %9 : i32 to index
      %11 = memref.load %arg1[%10] : memref<16xi32, #tpu.memory_space<smem>>
      %12 = arith.index_cast %11 : i32 to index
      %c0 = arith.constant 0 : index
      %13 = vector.load %arg5[%12, %c0] : memref<64x128xf32, #tpu.memory_space<vmem>>, vector<1x128xf32>
      %14 = arith.index_cast %8 : i32 to index
      %c0_6 = arith.constant 0 : index
      %15 = vector.load %arg6[%14, %c0_6] : memref<8x128xf32, #tpu.memory_space<vmem>>, vector<1x128xf32>
      tpu.vector_store %arg6[%14, %c0_6], %13 {strides = array<i32>} : memref<8x128xf32, #tpu.memory_space<vmem>>, vector<1x128xf32>,
    }
    %c8_i32_1 = arith.constant 8 : i32
    %2 = arith.index_cast %arg0 : i32 to index
    %3 = memref.load %arg2[%2] : memref<2xi32, #tpu.memory_space<smem>>
    %c0_i32_2 = arith.constant 0 : i32
    %4 = arith.cmpi sgt, %3, %c0_i32_2 : i32
    %5 = arith.extui %4 : i1 to i32
    %c0_i32_3 = arith.constant 0 : i32
    %6 = arith.cmpi ne, %5, %c0_i32_3 : i32
    scf.if %6 {
      %c0 = arith.constant 0 : index
      %c0_4 = arith.constant 0 : index
      %7 = vector.load %arg3[%c0, %c0_4] : memref<8x128xf32, #tpu.memory_space<vmem>>, vector<8x128xf32>
      %c0_5 = arith.constant 0 : index
      %c0_6 = arith.constant 0 : index
      %8 = vector.load %arg4[%c0_5, %c0_6] : memref<128x128xf32, #tpu.memory_space<vmem>>, vector<128x128xf32>
      %cst = arith.constant dense<0.000000e+00> : vector<8x128xf32>
      %9 = tpu.matmul %7, %8, %cst {dimension_numbers = #tpu.dot_dimension_numbers<[1], [0], [0], [1], [0, 0, 1, 1], [], []>, precision = #tpu.contract_precision<fp32>} : vector<8x128xf32>, vector<128x128xf32>, vector<8x128xf32> -> vector<8x128xf32>
      %10 = arith.mulf %9, %9 : vector<8x128xf32>
      %cst_7 = arith.constant dense<0.000000e+00> : vector<8xf32>
      %11 = vector.multi_reduction <add>, %10, %cst_7 [1] : vector<8x128xf32> to vector<8xf32>
      %12 = vector.shape_cast %11 : vector<8xf32> to vector<8x1xf32>
      %cst_8 = arith.constant 1.280000e+02 : f32
      %13 = vector.broadcast %cst_8 : f32 to vector<8x1xf32>
      %14 = arith.divf %12, %13 : vector<8x1xf32>
      %cst_9 = arith.constant 9.99999974E-6 : f32
      %15 = vector.broadcast %cst_9 : f32 to vector<8x1xf32>
      %16 = arith.addf %14, %15 : vector<8x1xf32>
      %17 = math.rsqrt %16 : vector<8x1xf32>
      %18 = vector.broadcast %17 : vector<8x1xf32> to vector<8x128xf32>
      %19 = arith.mulf %9, %18 : vector<8x128xf32>
      %20 = vector.extract_strided_slice %7 {offsets = [0, 3], sizes = [8, 1], strides = [1, 1]} : vector<8x128xf32> to vector<8x1xf32>
      %cst_10 = arith.constant 5.000000e-01 : f32
      %21 = vector.broadcast %cst_10 : f32 to vector<8x1xf32>
      %22 = arith.cmpf ogt, %20, %21 : vector<8x1xf32>
      %c0_11 = arith.constant 0 : index
      %c0_12 = arith.constant 0 : index
      %23 = vector.load %arg6[%c0_11, %c0_12] : memref<8x128xf32, #tpu.memory_space<vmem>>, vector<8x128xf32>
      %24 = vector.shape_cast %22 : vector<8x1xi1> to vector<8x1xi1>
      %25 = vector.broadcast %24 : vector<8x1xi1> to vector<8x128xi1>
      %26 = arith.select %25, %19, %23 : vector<8x128xi1>, vector<8x128xf32>
      %c0_13 = arith.constant 0 : index
      %c0_14 = arith.constant 0 : index
      %27 = vector.load %arg6[%c0_13, %c0_14] : memref<8x128xf32, #tpu.memory_space<vmem>>, vector<8x128xf32>
      tpu.vector_store %arg6[%c0_13, %c0_14], %26 {strides = array<i32>} : memref<8x128xf32, #tpu.memory_space<vmem>>, vector<8x128xf32>,
    } else {
    }
    return
  }
  func.func @transform_0(%arg0: i32, %arg1: memref<16xi32, #tpu.memory_space<smem>>, %arg2: memref<2xi32, #tpu.memory_space<smem>>) -> (i32, i32) {
    %c0_i32 = arith.constant 0 : i32
    %c0_i32_0 = arith.constant 0 : i32
    return %arg0, %c0_i32 : i32, i32
  }
  func.func @transform_1(%arg0: i32, %arg1: memref<16xi32, #tpu.memory_space<smem>>, %arg2: memref<2xi32, #tpu.memory_space<smem>>) -> (i32, i32) {
    %c0_i32 = arith.constant 0 : i32
    %c0_i32_0 = arith.constant 0 : i32
    %c0_i32_1 = arith.constant 0 : i32
    return %c0_i32, %c0_i32_0 : i32, i32
  }
  func.func @transform_2(%arg0: i32, %arg1: memref<16xi32, #tpu.memory_space<smem>>, %arg2: memref<2xi32, #tpu.memory_space<smem>>) -> (i32, i32) {
    %c0_i32 = arith.constant 0 : i32
    %c0_i32_0 = arith.constant 0 : i32
    %c0_i32_1 = arith.constant 0 : i32
    return %c0_i32, %c0_i32_0 : i32, i32
  }
  func.func @transform_3(%arg0: i32, %arg1: memref<16xi32, #tpu.memory_space<smem>>, %arg2: memref<2xi32, #tpu.memory_space<smem>>) -> (i32, i32) {
    %c0_i32 = arith.constant 0 : i32
    %c0_i32_0 = arith.constant 0 : i32
    return %arg0, %c0_i32 : i32, i32
  }
}

</mosaic_0001>

<bundles_post_ra>
// kernel: tpu_custom_call.1
= control target key start
LH: loop header
LB: loop body
LE: loop exit
PB: predicated region body
PF: predicated region fallthrough
CT: control target
= control target key end

     0   :  { %s1057_s24 = smov [#allocation3]   ;;  %s1058_s25 = smov [#allocation4]   ;;  %s1504_s0 = inlined_call_operand.hbm [shape: s32[16], index: 0, kind: input, shape index: {}]   ;;  %s1505_s2 = inlined_call_operand.hbm [shape: f32[16,128], index: 2, kind: input, shape index: {}]   ;;  %s1506_s3 = inlined_call_operand.hbm [shape: f32[128,128], index: 3, kind: input, shape index: {}]   ;;  %s1507_s4 = inlined_call_operand.hbm [shape: f32[64,128], index: 4, kind: input, shape index: {}]   ;;  %s1508_s5 = inlined_call_operand.hbm [shape: f32[16,128], index: 5, kind: output, shape index: {}]   ;;  %s1509_s1 = inlined_call_operand.hbm [shape: s32[2], index: 1, kind: input, shape index: {}]  }
   0x1   :  { %s11_s20 = sshll.u32 %s1504_s0, 4  ;;  %s16_s23 = sshll.u32 %s1509_s1, 4  ;;  %s12_s20 = int_to_ptr.hbm [resolvable:$true] %s11_s20  ;;  %s17_s23 = int_to_ptr.hbm [resolvable:$true] %s16_s23 }
   0x2   :  { %14 = dma.hbm_to_smem %s12_s20, 16, %s1057_s24, [#allocation2] }
   0x3   :  { %19 = dma.hbm_to_smem %s17_s23, 16, %s1058_s25, [#allocation2] }
   0x4   :  { %1023 = dma.done.wait [#allocation2], 32 }
   0x5   :  { %1024 = vsyncadd [#allocation2], 4294967264 }
   0x6   :  { %22 = sfence }
   0x7   :  { %23 = vsyncpa [#allocation6], 0 }
   0x8   :  { %25 = vsyncpa [#allocation6 + $0x1], 0 }
   0x9   :  { %26 = vsyncpa [#allocation9], 0 }
   0xa   :  { %27 = vsyncpa [#allocation7], 0 }
   0xb   :  { %29 = vsyncpa [#allocation7 + $0x1], 0  ;;  %s1102_s26 = smov 0   ;;  %s1104_s0 = smov 0  }
   0xc   :  { %s1106_s27 = smov 0   ;;  %s1108_s1 = smov 0  }
   0xd LB: > { %s145_s30 = sshll.u32 %s1506_s3, 4  ;;  %s1126_s6 = sadd.s32 4294967295, %s1051_s1   ;;  %s1051_s1 = sphi %s1108_s1, %s1520_s1   ;;  %s1047_s27 = sphi %s1106_s27, %s1519_s27   ;;  %s1043_s0 = sphi %s1104_s0, %s1518_s0   ;;  %s1039_s26 = sphi %s1102_s26, %s1517_s26   ;;  %s146_s30 = int_to_ptr.hbm [resolvable:$true] %s145_s30 }
   0xe   : > { %p757_p0 = scmp.ge.s32.totalorder %s1051_s1, 1  ;;  %p56_p1 = scmp.eq.s32.totalorder %s1126_s6, 0 }
   0xf   : > { %p134_p2 = scmp.lt.s32.totalorder %s1051_s1, 3  ;;  %s1059_s8 = smov [#allocation8]  }
  0x10   : > { %s147_s9 = sshll.u32 %s1059_s8, 4  ;;  %s159_s12 = sshll.u32 %s1507_s4, 4  ;;  %s148_s9 = int_to_ptr.vmem [resolvable:$true] %s147_s9  ;;  %s160_s12 = int_to_ptr.hbm [resolvable:$true] %s159_s12 }
  0x11   : > { %p1131_p3 = pnand %p757_p0, %p134_p2  ;;  %s1060_s13 = smov [#allocation10]  }
  0x12   : > { %s161_s14 = sshll.u32 %s1060_s13, 4  ;;  %s1061_s15 = smov 128   ;;  %s162_s14 = int_to_ptr.vmem [resolvable:$true] %s161_s14 }
  0x13   : > { %p786_p4 = pneg %p1131_p3  ;;  %s1062_s16 = smov 8  }
  0x14   : > { %s756_s17 = sadd.s32 4294967294, %s1051_s1   ;;  %s1145_s18 = sadd.s32 1, %s1051_s1  }
  0x15   : > { %p787_p6 = pnand %p786_p4, %p56_p1  ;;  %s39_s19 = ssub.s32 %s1051_s1, %s1145_s18 }
  0x16   : > { %s42_s20 = sadd.s32 1, %s1047_s27  ;;  %p40_p7 = scmp.eq.s32.totalorder %s39_s19, 0 }
  0x17   : > { %789 = dma.hbm_to_vmem [thread:$0]  (!%p787_p6), %s146_s30, 2048, %s148_s9, [#allocation9], %s1061_s15, %s1061_s15, %s1062_s16  }
  0x18   : > { %792 = dma.hbm_to_vmem [thread:$0]  (!%p787_p6), %s160_s12, 1024, %s162_s14, [#allocation9], %s1061_s15, %s1061_s15, %s1062_s16  }
  0x19   : > { %p49_p8 = scmp.ne.s32.totalorder %s1047_s27, %s1043_s0  ;;  %p50_p9 = scmp.eq.s32.totalorder %s1051_s1, 0 }
  0x1a   : > { %p55_p10 = scmp.ne.s32.totalorder %s1043_s0, %s1039_s26  ;;  %p121_p13 = scmp.eq.s32.totalorder %s1126_s6, 1 }
  0x1b   : > { %s1156_s21 = scalar_select %p40_p7, %s1047_s27, %s42_s20  }
  0x1c   : > { %p1158_p11 = por %p50_p9, %p49_p8  ;;  %p1164_p12 = por %p56_p1, %p55_p10 }
  0x1d   : > { %p127_p0 = scmp.eq.s32.totalorder %s756_s17, 1  ;;  %p803_p2 = scmp.lt.s32.totalorder %s1051_s1, 2 }
  0x1e   : > { %s175_s24 = sand.u32 1, %s1047_s27   ;;  %p1171_p4 = por %p121_p13, %p49_p8 }
  0x1f   : > { %p1175_p6 = por %p127_p0, %p55_p10  ;;  %s761_s29 = sshll.u32 %s175_s24, 3 }
  0x20   : > { %s762_s30 = sshll.u32 %s1051_s1, 3  ;;  %s179_s11 = scalar_lea.vmem [#allocation5], %s761_s29 }
  0x21   : > { %s183_s10 = scalar_lea.hbm %s1505_s2, %s762_s30  ;;  %s187_s12 = sshll.u32 %s179_s11, 4  ;;  %s188_s12 = int_to_ptr.vmem [resolvable:$true] %s187_s12 }
  0x22   : > { %s185_s13 = sshll.u32 %s183_s10, 4  ;;  %p1185_p7 = pnand %p803_p2, %p1158_p11  ;;  %s186_s13 = int_to_ptr.hbm [resolvable:$true] %s185_s13 }
  0x23   : > { %s176_s15 = scalar_lea.sflag [#allocation6], %s175_s24  ;;  %s945_s16 = sshra.s32 %s186_s13, 4  ;;  %s946_s16 = int_to_ptr.hbm [resolvable:$true] %s945_s16 }
  0x24   : > { %s947_s17 = scalar_lea.hbm %s946_s16, 8  ;;  %p949_p9 = pneg %p1185_p7 }
  0x25   : > { %p948_p8 = scmp.ne.s32.totalorder %s946_s16, %s947_s17  ;;  %s952_s29 = scalar_lea.hbm %s1505_s2, 16 }
  0x26   : > { %p953_p11 = scmp.lt.s32.totalorder %s946_s16, %s1505_s2  ;;  %p954_p0 = scmp.lt.s32.totalorder %s952_s29, %s947_s17 }
  0x27   : > { %p950_p10 = pnand %p949_p9, %p948_p8 }
  0x28   : > { %p955_p2 = por %p954_p0, %p953_p11 }
  0x29   : > { %p951_p13 = pneg %p950_p10 }
  0x2b   : > { %p956_p5 = pnand %p955_p2, %p951_p13 }
  0x2d   : > { %959 = shalt.err (!%p956_p5)
}
  0x2e   : > { %796 = dma.hbm_to_vmem [thread:$0]  (!%p1185_p7), %s186_s13, 128, %s188_s12, %s176_s15  }
  0x2f   : > { %196 = sbr.rel (%p1131_p3) target bundleno = 433 (0x1b1), region = 32  ;;  %s1202_s24 = sand.u32 (!%p1131_p3), 1, %s1043_s0  }
  0x30   : > { %s764_s8 = sshll.u32 (!%p1131_p3), %s1202_s24, 3  ;;  %s199_s9 = scalar_lea.sflag (!%p1131_p3), [#allocation6], %s1202_s24 }
  0x31   : > { %s1206_s10 = scalar_lea.vmem (!%p1131_p3), [#allocation5], %s764_s8 }
  0x34   : > { %1026 = dma.done.wait (%p1164_p12), %s199_s9, 128  }
  0x35   : > { %1028 = vsyncadd (%p1164_p12), %s199_s9, 4294967168 }
  0x36   : > { %1030 = dma.done.wait (%p56_p1), [#allocation9], 3072  }
  0x37   : > { %1032 = vsyncadd (%p56_p1), [#allocation9], 4294964224  ;;  %s768_s7 = sshll.u32 %s1126_s6, 3  ;;  %s1217_s11 = scalar_lea.vmem [#allocation11], %s764_s8 }
  0x38   : > { %s1053_s12 = smov 0  }
  0x39 LB: >> { %s243_s13 = sadd.s32 %s1055_s12, %s768_s7  ;;  %s247_s14 = scalar_lea.vmem %s1217_s11, %s1055_s12 [#allocation11]  ;;  %s1055_s12 = sphi %s1053_s12, %s242_s12  }
  0x3a   : >> { %s244_s23 = sld [smem:[#allocation3 + %s243_s13]]  ;;  %s242_s12 = sadd.s32 1, %s1055_s12  }
  0x3b   : >> { %p239_p3 = scmp.ge.s32.totalorder %s242_s12, 8  }
  0x3c   : > { %s249_s16 = sld [smem:[#allocation4 + %s1126_s6]] (%p239_p3) }
  0x3e   : > { %241 = sbr.rel (!%p239_p3) target bundleno = 57 (0x39), region = 98 }
  0x40   : >> { %s245_s15 = scalar_lea.vmem [#allocation10], %s244_s23 }
  0x41   : >> { %v246_v0 = vld [vmem:[%s245_s15] sm:$0x1] }
  0x42   : >> { %248 = vst [vmem:[%s247_s14] sm:$0x1] %v246_v0  ;;  %p769_p1 = scmp.le.s32.totalorder (%p239_p3), %s249_s16, 0 }
  0x44   : > { %253 = sbr.rel (%p769_p1) target bundleno = 419 (0x1a3), region = 55 }
  0x49   : > { %v270_v1 = vld [vmem:[#allocation8 + $0x78] sm:$0xff]  ;;  %v269_v2 = vld [vmem:[#allocation8 + $0x70] sm:$0xff]  ;;  %v268_v3 = vld [vmem:[#allocation8 + $0x68] sm:$0xff] }
  0x4a   : > { %v1223_v4 = vand.u32 4294901760, %v270_v1  ;;  %v1225_v5 = vand.u32 4294901760, %v269_v2  ;;  %v1227_v6 = vand.u32 4294901760, %v268_v3  ;;  %v267_v7 = vld [vmem:[#allocation8 + $0x60] sm:$0xff]  ;;  %v266_v8 = vld [vmem:[#allocation8 + $0x58] sm:$0xff]  ;;  %v265_v9 = vld [vmem:[#allocation8 + $0x50] sm:$0xff] }
  0x4b   : > { %v1229_v10 = vand.u32 4294901760, %v267_v7  ;;  %v1231_v11 = vand.u32 4294901760, %v266_v8  ;;  %v1233_v12 = vand.u32 4294901760, %v265_v9  ;;  %v264_v13 = vld [vmem:[#allocation8 + $0x48] sm:$0xff]  ;;  %v263_v14 = vld [vmem:[#allocation8 + $0x40] sm:$0xff]  ;;  %v262_v19 = vld [vmem:[#allocation8 + $0x38] sm:$0xff] }
  0x4c   : > { %272 = vmatpush.msra.mxu0 %v1223_v4  ;;  %v1237_v15 = vsub.f32 %v270_v1, %v1223_v4  ;;  %v1240_v16 = vsub.f32 %v269_v2, %v1225_v5  ;;  %v1243_v17 = vsub.f32 %v268_v3, %v1227_v6  ;;  %v1245_v18 = vand.u32 4294901760, %v264_v13  ;;  %468 = vmatpush.msra.mxu3 %v1223_v4  ;;  %v261_v27 = vld [vmem:[#allocation8 + $0x30] sm:$0xff]  ;;  %v260_v37 = vld [vmem:[#allocation8 + $0x28] sm:$0xff]  ;;  %v259_v43 = vld [vmem:[#allocation8 + $0x20] sm:$0xff] }
  0x4d   : > { %v1249_v20 = vsub.f32 %v267_v7, %v1229_v10  ;;  %v1252_v21 = vsub.f32 %v266_v8, %v1231_v11  ;;  %v1255_v22 = vsub.f32 %v265_v9, %v1233_v12  ;;  %v1261_v26 = vand.u32 4294901760, %v263_v14  ;;  %v258_v48 = vld [vmem:[#allocation8 + $0x18] sm:$0xff]  ;;  %v257_v56 = vld [vmem:[#allocation8 + $0x10] sm:$0xff]  ;;  %v256_v61 = vld [vmem:[#allocation8 + $0x8] sm:$0xff] }
  0x4e   : > { %274 = vmatpush.msra.mxu0 %v1225_v5  ;;  %v314_v23 = vand.u32 4294901760, %v1237_v15  ;;  %v320_v24 = vand.u32 4294901760, %v1240_v16  ;;  %v326_v25 = vand.u32 4294901760, %v1243_v17  ;;  %415 = vmatpush.msra.mxu2 %v1237_v15  ;;  %v1265_v29 = vand.u32 4294901760, %v262_v19  ;;  %v255_v2 = vld [vmem:[#allocation8] sm:$0xff]  ;;  %v1348_v8 = vld [vmem:[%s1206_s10] sm:$0xff] }
  0x4f   : > { %v332_v28 = vand.u32 4294901760, %v1249_v20  ;;  %v1268_v30 = vsub.f32 %v264_v13, %v1245_v18  ;;  %470 = vmatpush.msra.mxu3 %v1225_v5  ;;  %v338_v34 = vand.u32 4294901760, %v1252_v21  ;;  %v344_v35 = vand.u32 4294901760, %v1255_v22 }
  0x50   : > { %276 = vmatpush.msra.mxu0 %v1227_v6  ;;  %v315_v31 = vsub.f32 %v1237_v15, %v314_v23  ;;  %v321_v32 = vsub.f32 %v1240_v16, %v320_v24  ;;  %v327_v33 = vsub.f32 %v1243_v17, %v326_v25  ;;  %418 = vmatpush.msra.mxu2 %v1240_v16  ;;  %v1284_v36 = vand.u32 4294901760, %v261_v27 }
  0x51   : > { %472 = vmatpush.msra.mxu3 %v1227_v6  ;;  %v333_v40 = vsub.f32 %v1249_v20, %v332_v28  ;;  %v1292_v41 = vsub.f32 %v263_v14, %v1261_v26  ;;  %v350_v42 = vand.u32 4294901760, %v1268_v30  ;;  %v339_v45 = vsub.f32 %v1252_v21, %v338_v34 }
  0x52   : > { %v316_v38 = vand.u32 4294901760, %v315_v31  ;;  %278 = vmatpush.msra.mxu0 %v1229_v10  ;;  %v322_v39 = vand.u32 4294901760, %v321_v32  ;;  %421 = vmatpush.msra.mxu2 %v1243_v17  ;;  %v328_v44 = vand.u32 4294901760, %v327_v33  ;;  %v1301_v46 = vand.u32 4294901760, %v260_v37 }
  0x53   : > { %474 = vmatpush.msra.mxu3 %v1229_v10  ;;  %v1304_v47 = vsub.f32 %v262_v19, %v1265_v29  ;;  %v345_v49 = vsub.f32 %v1255_v22, %v344_v35  ;;  %v334_v50 = vand.u32 4294901760, %v333_v40  ;;  %v356_v51 = vand.u32 4294901760, %v1292_v41 }
  0x54   : > { %317 = vmatpush.msra.mxu1 %v316_v38  ;;  %280 = vmatpush.msra.mxu0 %v1231_v11  ;;  %v1313_v52 = vand.u32 4294901760, %v259_v43  ;;  %v1316_v53 = vsub.f32 %v261_v27, %v1284_v36  ;;  %v351_v54 = vsub.f32 %v1268_v30, %v350_v42  ;;  %v1321_v55 = vand.u32 4294901760, %v258_v48 }
  0x55   : > { %424 = vmatpush.msra.mxu2 %v1249_v20  ;;  %476 = vmatpush.msra.mxu3 %v1231_v11  ;;  %v340_v57 = vand.u32 4294901760, %v339_v45  ;;  %v362_v58 = vand.u32 4294901760, %v1304_v47  ;;  %v1328_v59 = vsub.f32 %v260_v37, %v1301_v46  ;;  %v346_v60 = vand.u32 4294901760, %v345_v49 }
  0x56   : > { %323 = vmatpush.msra.mxu1 %v322_v39  ;;  %282 = vmatpush.msra.mxu0 %v1233_v12  ;;  %v357_v62 = vsub.f32 %v1292_v41, %v356_v51  ;;  %v368_v63 = vand.u32 4294901760, %v1316_v53  ;;  %v1337_v0 = vand.u32 4294901760, %v257_v56  ;;  %v1340_v1 = vsub.f32 %v259_v43, %v1313_v52 }
  0x57   : > { %427 = vmatpush.msra.mxu2 %v1252_v21  ;;  %478 = vmatpush.msra.mxu3 %v1233_v12  ;;  %v352_v3 = vand.u32 4294901760, %v351_v54  ;;  %v1343_v7 = vsub.f32 %v258_v48, %v1321_v55  ;;  %v363_v9 = vsub.f32 %v1304_v47, %v362_v58  ;;  %v374_v13 = vand.u32 4294901760, %v1328_v59 }
  0x58   : > { %329 = vmatpush.msra.mxu1 %v328_v44  ;;  %284 = vmatpush.msra.mxu0 %v1245_v18  ;;  %v1355_v14 = vand.u32 4294901760, %v256_v61  ;;  %v1358_v19 = vand.u32 4294901760, %v1348_v8  ;;  %v1360_v27 = vand.u32 4294901760, %v255_v2  ;;  %v358_v31 = vand.u32 4294901760, %v357_v62 }
  0x59   : > { %430 = vmatpush.msra.mxu2 %v1255_v22  ;;  %480 = vmatpush.msra.mxu3 %v1245_v18  ;;  %v369_v32 = vsub.f32 %v1316_v53, %v368_v63  ;;  %v380_v33 = vand.u32 4294901760, %v1340_v1  ;;  %v1370_v37 = vsub.f32 %v257_v56, %v1337_v0  ;;  %v386_v38 = vand.u32 4294901760, %v1343_v7 }
  0x5a   : > { %335 = vmatpush.msra.mxu1 %v334_v50  ;;  %286 = vmatpush.msra.mxu0 %v1261_v26  ;;  %v364_v39 = vand.u32 4294901760, %v363_v9  ;;  %v375_v40 = vsub.f32 %v1328_v59, %v374_v13  ;;  %v1380_v43 = vsub.f32 %v256_v61, %v1355_v14  ;;  %v304_v44 = vsub.f32 %v1348_v8, %v1358_v19 }
  0x5b   : > { %433 = vmatpush.msra.mxu2 %v1268_v30  ;;  %482 = vmatpush.msra.mxu3 %v1261_v26  ;;  %v370_v45 = vand.u32 4294901760, %v369_v32  ;;  %v381_v48 = vsub.f32 %v1340_v1, %v380_v33  ;;  %v392_v49 = vand.u32 4294901760, %v1370_v37  ;;  %v1392_v50 = vsub.f32 %v255_v2, %v1360_v27 }
  0x5c   : > { %341 = vmatpush.msra.mxu1 %v340_v57  ;;  %288 = vmatpush.msra.mxu0 %v1265_v29  ;;  %v376_v54 = vand.u32 4294901760, %v375_v40  ;;  %v387_v56 = vsub.f32 %v1343_v7, %v386_v38  ;;  %v398_v57 = vand.u32 4294901760, %v1380_v43  ;;  %vm635_vm0 = vcmp.gt.f32.partialorder %v1348_v8, 0.5 }
  0x5d   : > { %436 = vmatpush.msra.mxu2 %v1292_v41  ;;  %484 = vmatpush.msra.mxu3 %v1265_v29  ;;  %v382_v61 = vand.u32 4294901760, %v381_v48  ;;  %v393_v62 = vsub.f32 %v1370_v37, %v392_v49  ;;  %v404_v2 = vand.u32 4294901760, %v1392_v50 }
  0x5e   : > { %347 = vmatpush.msra.mxu1 %v346_v60  ;;  %290 = vmatpush.msra.mxu0 %v1284_v36  ;;  %v305_v60 = vand.u32 4294901760, %v304_v44  ;;  %v399_v9 = vsub.f32 %v1380_v43, %v398_v57 }
  0x5f   : > { %439 = vmatpush.msra.mxu2 %v1304_v47  ;;  %486 = vmatpush.msra.mxu3 %v1284_v36  ;;  %v394_v32 = vand.u32 4294901760, %v393_v62 }
  0x60   : > { %353 = vmatpush.msra.mxu1 %v352_v3  ;;  %292 = vmatpush.msra.mxu0 %v1301_v46  ;;  %v388_v3 = vand.u32 4294901760, %v387_v56  ;;  %v400_v40 = vand.u32 4294901760, %v399_v9 }
  0x61   : > { %442 = vmatpush.msra.mxu2 %v1316_v53  ;;  %488 = vmatpush.msra.mxu3 %v1301_v46 }
  0x62   : > { %359 = vmatpush.msra.mxu1 %v358_v31  ;;  %294 = vmatpush.msra.mxu0 %v1313_v52  ;;  %v306_v31 = vsub.f32 %v304_v44, %v305_v60 }
  0x63   : > { %445 = vmatpush.msra.mxu2 %v1328_v59  ;;  %490 = vmatpush.msra.mxu3 %v1313_v52 }
  0x64   : > { %365 = vmatpush.msra.mxu1 %v364_v39  ;;  %296 = vmatpush.msra.mxu0 %v1321_v55  ;;  %v405_v39 = vsub.f32 %v1392_v50, %v404_v2 }
  0x65   : > { %448 = vmatpush.msra.mxu2 %v1340_v1  ;;  %492 = vmatpush.msra.mxu3 %v1321_v55 }
  0x66   : > { %371 = vmatpush.msra.mxu1 %v370_v45  ;;  %298 = vmatpush.msra.mxu0 %v1337_v0  ;;  %v307_v45 = vand.u32 4294901760, %v306_v31  ;;  %v406_v48 = vand.u32 4294901760, %v405_v39 }
  0x67   : > { %451 = vmatpush.msra.mxu2 %v1343_v7  ;;  %494 = vmatpush.msra.mxu3 %v1337_v0 }
  0x68   : > { %377 = vmatpush.msra.mxu1 %v376_v54  ;;  %300 = vmatpush.msra.mxu0 %v1355_v14 }
  0x69   : > { %454 = vmatpush.msra.mxu2 %v1370_v37  ;;  %496 = vmatpush.msra.mxu3 %v1355_v14 }
  0x6a   : > { %383 = vmatpush.msra.mxu1 %v382_v61  ;;  %302 = vmatpush.msra.mxu0 %v1360_v27 }
  0x6b   : > { %457 = vmatpush.msra.mxu2 %v1380_v43  ;;  %498 = vmatpush.msra.mxu3 %v1360_v27 }
  0x6c   : > { %509 = vmatpush.msrb.mxu0 %v314_v23  ;;  %389 = vmatpush.msra.mxu1 %v388_v3  ;;  %v1064_v23 = vmov 0  }
  0x6d   : > { %460 = vmatpush.msra.mxu2 %v1392_v50  ;;  %502 = vmatmul.f32.vlgmr.msra.gmra.mxu3 %v305_v60 }
  0x6e   : > { %513 = vmatpush.msrb.mxu0 %v320_v24  ;;  %395 = vmatpush.msra.mxu1 %v394_v32  ;;  %v637_v24 = vsel %vm635_vm0, 1, %v1064_v23 }
  0x6f   : > { %463 = vmatmul.f32.vlgmr.msra.gmra.mxu2 %v304_v44  ;;  %308 = vmatmul.f32.vlgmr.msra.gmra.mxu0 %v307_v45 }
  0x70   : > { %517 = vmatpush.msrb.mxu0 %v326_v25  ;;  %401 = vmatpush.msra.mxu1 %v400_v40  ;;  %v1065_v25 = vmov 128.0  }
  0x71   : > { %857 = vrcp.f32 %v1065_v25 }
  0x72   : > { %521 = vmatpush.msrb.mxu0 %v332_v28  ;;  %407 = vmatpush.msra.mxu1 %v406_v48 }
  0x73   : > { %409 = vmatmul.f32.vlgmr.msra.gmra.mxu1 %v1358_v19 }
  0x74   : > { %576 = vmatpush.msrb.mxu1 %v1223_v4  ;;  %525 = vmatpush.msrb.mxu0 %v338_v34  ;;  %v1063_v4 = vmov 3  }
  0x75   : > { %856 = vset.pattern.permute.xlu0 %v1063_v4 }
  0x76   : > { %578 = vmatpush.msrb.mxu1 %v1225_v5  ;;  %529 = vmatpush.msrb.mxu0 %v344_v35 }
  0x78   : > { %580 = vmatpush.msrb.mxu1 %v1227_v6  ;;  %533 = vmatpush.msrb.mxu0 %v350_v42 }
  0x7a   : > { %582 = vmatpush.msrb.mxu1 %v1229_v10  ;;  %537 = vmatpush.msrb.mxu0 %v356_v51 }
  0x7c   : > { %584 = vmatpush.msrb.mxu1 %v1231_v11  ;;  %541 = vmatpush.msrb.mxu0 %v362_v58 }
  0x7e   : > { %586 = vmatpush.msrb.mxu1 %v1233_v12  ;;  %545 = vmatpush.msrb.mxu0 %v368_v63  ;;  %v636_v63 = vld [vmem:[%s1217_s11] sm:$0xff] }
  0x80   : > { %588 = vmatpush.msrb.mxu1 %v1245_v18  ;;  %549 = vmatpush.msrb.mxu0 %v374_v13 }
  0x82   : > { %590 = vmatpush.msrb.mxu1 %v1261_v26  ;;  %553 = vmatpush.msrb.mxu0 %v380_v33  ;;  %v858_v26 = vpop.eup %857 }
  0x83   : > { %v616_v28 = vmul.f32 128.0, %v858_v26  ;;  %vm620_vm1 = vweird.f32 %v858_v26 }
  0x84   : > { %592 = vmatpush.msrb.mxu1 %v1265_v29  ;;  %557 = vmatpush.msrb.mxu0 %v386_v38 }
  0x85   : > { %v617_v29 = vsub.f32 1.0, %v616_v28 }
  0x86   : > { %594 = vmatpush.msrb.mxu1 %v1284_v36  ;;  %561 = vmatpush.msrb.mxu0 %v392_v49 }
  0x87   : > { %v618_v30 = vmul.f32 %v858_v26, %v617_v29 }
  0x88   : > { %596 = vmatpush.msrb.mxu1 %v1301_v46  ;;  %565 = vmatpush.msrb.mxu0 %v398_v57 }
  0x89   : > { %v619_v34 = vadd.f32 %v858_v26, %v618_v30 }
  0x8a   : > { %598 = vmatpush.msrb.mxu1 %v1313_v52  ;;  %569 = vmatpush.msrb.mxu0 %v404_v2 }
  0x8b   : > { %571 = vmatmul.f32.vlgmr.msrb.gmra.mxu0 %v1358_v19  ;;  %v621_v35 = vsel %vm620_vm1, %v858_v26, %v619_v34 }
  0x8c   : > { %600 = vmatpush.msrb.mxu1 %v1321_v55 }
  0x8e   : > { %602 = vmatpush.msrb.mxu1 %v1337_v0 }
  0x90   : > { %604 = vmatpush.msrb.mxu1 %v1355_v14 }
  0x92   : > { %606 = vmatpush.msrb.mxu1 %v1360_v27 }
  0x93   : > { %608 = vmatmul.f32.vlgmr.msrb.gmra.mxu1 %v1358_v19 }
  0xec   : > { %v309_v6 = vpop.f32.mrf.mxu0 }
  0xf0   : > { %v410_v5 = vpop.f32.mrf.mxu1  ;;  %v503_v15 = vpop.f32.mrf.mxu3 }
  0xf1   : > { %v411_v10 = vadd.f32 %v410_v5, %v309_v6 }
  0xf2   : > { %v464_v11 = vpop.f32.mrf.mxu2 }
  0xf3   : > { %v465_v12 = vadd.f32 %v464_v11, %v411_v10 }
  0xf5   : > { %v504_v16 = vadd.f32 %v503_v15, %v465_v12 }
 0x108   : > { %v572_v17 = vpop.f32.mrf.mxu0 }
 0x109   : > { %v573_v18 = vadd.f32 %v572_v17, %v504_v16 }
 0x110   : > { %v609_v20 = vpop.f32.mrf.mxu1 }
 0x111   : > { %v610_v21 = vadd.f32 %v609_v20, %v573_v18 }
 0x113   : > { %v612_v22 = vmul.f32 %v610_v21, %v610_v21 }
 0x115   : > { %613 = vadd.xlane.f32.xlu0 %v612_v22 }
 0x129   : > { %639 = vperm.xlu0 %856, %v637_v24  }
 0x188   : > { %v614_v36 = vpop.xlane.xlu0 %613 }
 0x189   : > { %v622_v41 = vmul.f32 %v621_v35, %v614_v36 }
 0x18b   : > { %v623_v42 = vadd.f32 1e-05, %v622_v41 }
 0x18d   : > { %859 = vrsqrt.f32 %v623_v42  ;;  %vm630_vm3 = vweird.f32 %v623_v42 }
 0x193   : > { %v860_v46 = vpop.eup %859 }
 0x194   : > { %v625_v47 = vmul.f32 %v860_v46, %v623_v42  ;;  %vm631_vm2 = vweird.f32 %v860_v46 }
 0x195   : > { %vm632_vm4 = vmor %vm630_vm3, %vm631_vm2 }
 0x196   : > { %v626_v51 = vmul.f32 %v860_v46, %v625_v47 }
 0x198   : > { %v627_v52 = vmul.f32 0.5, %v626_v51 }
 0x19a   : > { %v628_v53 = vsub.f32 1.5, %v627_v52 }
 0x19b   : > { %v640_v55 = vpop.permute.xlu0 %639 }
 0x19c   : > { %v629_v58 = vmul.f32 %v860_v46, %v628_v53  ;;  %vm641_vm5 = vcmp.eq.s32.totalorder %v640_v55, 1 }
 0x19e   : > { %v633_v59 = vsel %vm632_vm4, %v860_v46, %v629_v58 }
 0x19f   : > { %v634_v0 = vmul.f32 %v633_v59, %v610_v21 }
 0x1a1   : > { %v642_v1 = vsel %vm641_vm5, %v634_v0, %v636_v63 }
 0x1a2   : > { %643 = vst [vmem:[%s1217_s11] sm:$0xff] %v642_v1 }
 0x1a3 PF: > { %s655_s20 = scalar_lea.hbm %s1508_s5, %s768_s7  ;;  %s657_s29 = sshll.u32 %s1217_s11, 4  ;;  %s658_s29 = int_to_ptr.vmem [resolvable:$true] %s657_s29 }
 0x1a4   : > { %s659_s30 = sshll.u32 %s655_s20, 4  ;;  %s645_s22 = scalar_lea.sflag [#allocation7], %s1202_s24  ;;  %s660_s30 = int_to_ptr.hbm [resolvable:$true] %s659_s30 }
 0x1a5   : > { %s989_s8 = sshra.s32 %s660_s30, 4  ;;  %s995_s12 = scalar_lea.hbm %s1508_s5, 16  ;;  %s990_s8 = int_to_ptr.hbm [resolvable:$true] %s989_s8 }
 0x1a6   : > { %s991_s9 = scalar_lea.hbm %s990_s8, 8  ;;  %p996_p8 = scmp.lt.s32.totalorder %s990_s8, %s1508_s5 }
 0x1a7   : > { %p992_p5 = scmp.ne.s32.totalorder %s990_s8, %s991_s9  ;;  %p997_p9 = scmp.lt.s32.totalorder %s995_s12, %s991_s9 }
 0x1a9   : > { %p993_p12 = pnand %p992_p5, %p1171_p4  ;;  %p998_p10 = por %p997_p9, %p996_p8 }
 0x1ab   : > { %p994_p7 = pneg %p993_p12 }
 0x1ad   : > { %p999_p13 = pnand %p998_p10, %p994_p7 }
 0x1af   : > { %1002 = shalt.err (!%p999_p13)
}
 0x1b0   : > { %784 = dma.vmem_to_hbm [thread:$0]  (%p1171_p4), %s658_s29, 128, %s660_s30, %s645_s22  }
 0x1b1 PF: > { %s671_s24 = sand.u32 1, %s1039_s26   ;;  %p1516_p11 = scmp.ge.s32.totalorder %s1051_s1, 2 }
 0x1b2   : > { %s672_s7 = scalar_lea.sflag [#allocation7], %s671_s24 }
 0x1b3   : > { %p798_p0 = pnand %p1516_p11, %p1175_p6 }
 0x1b5   : > { %p799_p2 = pneg %p798_p0 }
 0x1b7   : > { %1034 = dma.done.wait (%p799_p2), %s672_s7, 128  }
 0x1b8   : > { %1036 = vsyncadd (%p799_p2), %s672_s7, 4294967168  ;;  %p32_p3 = scmp.ge.s32.totalorder %s1145_s18, 4   ;;  %s1517_s26 = smov %s1043_s0 }
 0x1b9   : > { %s1518_s0 = smov %s1047_s27  ;;  %s1519_s27 = smov %s1156_s21 }
 0x1ba   : > { %s1520_s1 = smov %s1145_s18  ;;  %34 = sbr.rel (!%p32_p3) target bundleno = 13 (0xd), region = 109 }
 0x1bf   :  { %678 = vsyncpa [#allocation6], 1 }
 0x1c0   :  { %680 = vsyncpa [#allocation6 + $0x1], 1 }
 0x1c1   :  { %681 = vsyncpa [#allocation9], 1 }
 0x1c2   :  { %682 = vsyncpa [#allocation7], 1 }
 0x1c3   :  { %684 = vsyncpa [#allocation7 + $0x1], 1 }

</bundles_post_ra>
